<compile_context>
chip_gen: v6e
topology: v6e:2x2x1
jax: 0.10.0
libtpu: 0.0.40
codegen_flags: <defaults>
</compile_context>

<pallas_src>
import functools

import jax
import jax.numpy as jnp
import numpy as np
from jax.experimental import pallas as pl
from jax.experimental.pallas import tpu as pltpu


def make_positional_encoding(n_poses_max: int, d_model: int) -> np.ndarray:
    """Deterministic pe buffer, reproducing the PyTorch __init__ exactly."""
    assert d_model % 2 == 0, "PositionalEncoding requires an even d_model"
    angle = lambda pos, i: pos / 10000 ** (i / d_model)
    poses = np.arange(0, n_poses_max)
    circle_index = np.arange(0, d_model / 2)
    xv, yv = np.meshgrid(poses, circle_index)
    points = np.zeros((n_poses_max, d_model))
    points[:, ::2] = np.sin(angle(xv.T, yv.T))
    points[:, 1::2] = np.cos(angle(xv.T, yv.T))
    return points[None, :, :]  # (1, n_poses_max, d_model)


def _pe_add_kernel(x_ref, pe_ref, o_ref, *, scale: float):
    # Compute the tile in f32 (parity with torch's promotion of x * sqrt(d)),
    # cast on store. pe tile cast happens here per-tile, never as a separate
    # full-buffer XLA op in the wrapper. `scale` is a Python float immediate.
    x = x_ref[...].astype(jnp.float32)
    pe = pe_ref[...].astype(jnp.float32)       # (1, TS, D) broadcasts over B
    o_ref[...] = (x * scale + pe).astype(o_ref.dtype)


# Pipelined VMEM footprint budget (2 buffers x (x + pe + out) tiles) and the
# explicit scoped-VMEM limit. 24 MiB budget + 28 MiB limit fits v7x's 32 MiB
# scoped default / 64 MiB physical and is well under v5e/v6e physical 128 MiB.
_VMEM_BUDGET_BYTES = 24 << 20
_VMEM_LIMIT_BYTES = 28 << 20


def _pick_seq_tile(B: int, S: int, D: int, itemsize: int,
                   budget_bytes: int = _VMEM_BUDGET_BYTES) -> int:
    """Largest dtype-aligned seq tile whose pipelined footprint fits the budget."""
    # Packed-sublane multiple: 8 for 4-byte, 16 for 2-byte, 32 for 1-byte dtypes.
    sub = max(8, 32 // max(1, itemsize))
    s_pad = ((S + sub - 1) // sub) * sub
    # Per seq-row VMEM bytes with double buffering of x, pe and out tiles.
    row_bytes = 2 * (2 * B + 1) * D * itemsize
    ts = max(sub, (budget_bytes // row_bytes) // sub * sub)
    # Keep >= 2 grid steps when possible so the pipeline overlaps DMA with
    # compute/store and a v7x megacore grid has something to shard.
    if s_pad >= 2 * sub:
        half = (((s_pad + 1) // 2 + sub - 1) // sub) * sub
        ts = min(ts, half)
    return int(min(ts, s_pad))


def positional_encoding_forward(x: jax.Array, pe: jax.Array, d_model: int) -> jax.Array:
    """x: (B, S, D); pe: (1, n_poses_max, D). Returns (B, S, D) in x.dtype."""
    B, S, D = x.shape
    assert D == d_model
    assert pe.shape[1] >= S, "sequence longer than n_poses_max"

    # torch.sqrt(torch.tensor(int)) -> sqrt(d_model). Python float immediate.
    scale = float(np.sqrt(float(d_model)))
    out_dtype = x.dtype

    # Lane-dense fallback: if D is not a multiple of 128 but S*D is, present a
    # 128-wide last dim so stores are unmasked. (Demo/default d_model already
    # lane-dense, so this path is idle there.)
    reshaped = False
    if D % 128 != 0 and (S * D) % 128 == 0:
        pe_s = jax.lax.slice_in_dim(pe, 0, S, axis=1)
        S2, D2 = (S * D) // 128, 128
        x2 = x.reshape(B, S2, D2)
        pe2 = pe_s.reshape(1, S2, D2)
        reshaped = True
    else:
        x2, pe2 = x, pe
        S2, D2 = S, D

    x_item = jnp.dtype(x2.dtype).itemsize
    pe_item = jnp.dtype(pe2.dtype).itemsize
    TS = _pick_seq_tile(B, S2, D2, max(x_item, pe_item))
    num_s = (S2 + TS - 1) // TS   # cdiv: ragged last block handled by Pallas

    kernel = functools.partial(_pe_add_kernel, scale=scale)

    cost = pl.CostEstimate(
        flops=2 * B * S2 * D2,
        bytes_accessed=2 * B * S2 * D2 * x_item + S2 * D2 * pe_item,
        transcendentals=0,
    )

    out = pl.pallas_call(
        kernel,
        out_shape=jax.ShapeDtypeStruct((B, S2, D2), out_dtype),
        grid_spec=pltpu.PrefetchScalarGridSpec(
            num_scalar_prefetch=0,
            grid=(num_s,),
            in_specs=[
                pl.BlockSpec((B, TS, D2), lambda s: (0, s, 0)),   # x tile (batch folded)
                pl.BlockSpec((1, TS, D2), lambda s: (0, s, 0)),   # pe tile (broadcast in-kernel)
            ],
            out_specs=pl.BlockSpec((B, TS, D2), lambda s: (0, s, 0)),
        ),
        compiler_params=pltpu.CompilerParams(
            dimension_semantics=("parallel",),
            vmem_limit_bytes=_VMEM_LIMIT_BYTES,
        ),
        cost_estimate=cost,
    )(x2, pe2)

    if reshaped:
        out = out.reshape(B, S, D)
    return out
    # TODO(synk): largest remaining win is structural — fuse this scale+add
    # into the producing embedding lookup or the consuming dropout/layernorm
    # kernel to remove one full HBM round-trip of x.


if __name__ == "__main__":
    # Small, module-consistent shapes. d_model=128 keeps the output lane-dense.
    batch, seq, d_model = 2, 16, 128
    n_poses_max = 64

    pe_np = make_positional_encoding(n_poses_max, d_model)
    pe = jnp.asarray(pe_np, dtype=jnp.float32)

    key = jax.random.PRNGKey(0)
    x = jax.random.normal(key, (batch, seq, d_model), dtype=jnp.float32)

    scale = np.sqrt(float(d_model))

    # f32 path
    out = jax.block_until_ready(positional_encoding_forward(x, pe, d_model))
    ref = x * scale + pe[:, :seq, :].astype(x.dtype)
    np.testing.assert_allclose(np.asarray(out), np.asarray(ref), rtol=1e-6, atol=1e-6)

    # bf16 path (exercises dtype-aware sublane alignment + in-kernel f32 math,
    # pe kept in f32 with no wrapper-side astype). Output stays in x.dtype.
    x_bf16 = x.astype(jnp.bfloat16)
    out_bf = jax.block_until_ready(positional_encoding_forward(x_bf16, pe, d_model))
    ref_bf = (x_bf16.astype(jnp.float32) * scale + pe[:, :seq, :]).astype(jnp.bfloat16)
    np.testing.assert_allclose(np.asarray(out_bf, dtype=np.float32),
                               np.asarray(ref_bf, dtype=np.float32),
                               rtol=2e-2, atol=2e-2)

    print("KERNEL_OK")
</pallas_src>

<mosaic_0001>
module attributes {stable_mosaic.version = 11 : i64} {
  func.func @_pe_add_kernel(%arg0: i32, %arg1: memref<2x8x128xf32, #tpu.memory_space<vmem>>, %arg2: memref<1x8x128xf32, #tpu.memory_space<vmem>>, %arg3: memref<2x8x128xf32, #tpu.memory_space<vmem>>) attributes {dimension_semantics = [#tpu.dimension_semantics<parallel>], iteration_bounds = array<i64: 2>, scalar_prefetch = 0 : i64, scratch_operands = 0 : i64, tpu.core_type = #tpu.core_type<tc>, window_params = [{transform_indices = @transform_0, window_bounds = array<i64: 2, 8, 128>}, {transform_indices = @transform_1, window_bounds = array<i64: 1, 8, 128>}, {transform_indices = @transform_2, window_bounds = array<i64: 2, 8, 128>}]} {
    %c0 = arith.constant 0 : index
    %c0_0 = arith.constant 0 : index
    %c0_1 = arith.constant 0 : index
    %0 = vector.load %arg1[%c0, %c0_0, %c0_1] : memref<2x8x128xf32, #tpu.memory_space<vmem>>, vector<2x8x128xf32>
    %c0_2 = arith.constant 0 : index
    %c0_3 = arith.constant 0 : index
    %c0_4 = arith.constant 0 : index
    %1 = vector.load %arg2[%c0_2, %c0_3, %c0_4] : memref<1x8x128xf32, #tpu.memory_space<vmem>>, vector<1x8x128xf32>
    %cst = arith.constant 11.3137083 : f32
    %2 = vector.broadcast %cst : f32 to vector<2x8x128xf32>
    %3 = arith.mulf %0, %2 : vector<2x8x128xf32>
    %4 = vector.broadcast %1 : vector<1x8x128xf32> to vector<2x8x128xf32>
    %5 = arith.addf %3, %4 : vector<2x8x128xf32>
    %c0_5 = arith.constant 0 : index
    %c0_6 = arith.constant 0 : index
    %c0_7 = arith.constant 0 : index
    %6 = vector.load %arg3[%c0_5, %c0_6, %c0_7] : memref<2x8x128xf32, #tpu.memory_space<vmem>>, vector<2x8x128xf32>
    tpu.vector_store %arg3[%c0_5, %c0_6, %c0_7], %5 {strides = array<i32>} : memref<2x8x128xf32, #tpu.memory_space<vmem>>, vector<2x8x128xf32>,
    return
  }
  func.func @transform_0(%arg0: i32) -> (i32, i32, i32) {
    %c0_i32 = arith.constant 0 : i32
    %c0_i32_0 = arith.constant 0 : i32
    %c0_i32_1 = arith.constant 0 : i32
    return %c0_i32, %arg0, %c0_i32_0 : i32, i32, i32
  }
  func.func @transform_1(%arg0: i32) -> (i32, i32, i32) {
    %c0_i32 = arith.constant 0 : i32
    %c0_i32_0 = arith.constant 0 : i32
    %c0_i32_1 = arith.constant 0 : i32
    return %c0_i32, %arg0, %c0_i32_0 : i32, i32, i32
  }
  func.func @transform_2(%arg0: i32) -> (i32, i32, i32) {
    %c0_i32 = arith.constant 0 : i32
    %c0_i32_0 = arith.constant 0 : i32
    %c0_i32_1 = arith.constant 0 : i32
    return %c0_i32, %arg0, %c0_i32_0 : i32, i32, i32
  }
}

</mosaic_0001>

<bundles_post_ra>
// kernel: tpu_custom_call.1
= control target key start
LH: loop header
LB: loop body
LE: loop exit
PB: predicated region body
PF: predicated region fallthrough
CT: control target
= control target key end

     0   :  { %7 = vsyncpa [#allocation3], 0  ;;  %s744_s0 = inlined_call_operand.hbm [shape: f32[2,16,128], index: 0, kind: input, shape index: {}]   ;;  %s745_s1 = inlined_call_operand.hbm [shape: f32[1,64,128], index: 1, kind: input, shape index: {}]   ;;  %s746_s2 = inlined_call_operand.hbm [shape: f32[2,16,128], index: 2, kind: output, shape index: {}]  }
   0x1   :  { %9 = vsyncpa [#allocation3 + $0x1], 0 }
   0x2   :  { %10 = vsyncpa [#allocation6], 0 }
   0x3   :  { %12 = vsyncpa [#allocation6 + $0x1], 0 }
   0x4   :  { %13 = vsyncpa [#allocation4], 0 }
   0x5   :  { %15 = vsyncpa [#allocation4 + $0x1], 0  ;;  %s538_s9 = smov 0   ;;  %s540_s10 = smov 0  }
   0x6   :  { %s542_s11 = smov 0   ;;  %s544_s12 = smov 0  }
   0x7 LB: > { %s559_s13 = sadd.s32 4294967295, %s512_s12   ;;  %s316_s14 = sadd.s32 4294967294, %s512_s12   ;;  %s512_s12 = sphi %s544_s12, %s764_s12   ;;  %s508_s11 = sphi %s542_s11, %s763_s11   ;;  %s504_s10 = sphi %s540_s10, %s762_s10   ;;  %s500_s9 = sphi %s538_s9, %s761_s9  }
   0x8   : > { %s563_s15 = sadd.s32 1, %s512_s12   ;;  %s28_s16 = sadd.s32 1, %s508_s11 }
   0x9   : > { %s25_s17 = ssub.s32 %s512_s12, %s563_s15  ;;  %p35_p0 = scmp.ne.s32.totalorder %s508_s11, %s504_s10 }
   0xa   : > { %p26_p1 = scmp.eq.s32.totalorder %s25_s17, 0  ;;  %p36_p2 = scmp.eq.s32.totalorder %s512_s12, 0 }
   0xb   : > { %p41_p3 = scmp.ne.s32.totalorder %s504_s10, %s500_s9  ;;  %p42_p4 = scmp.eq.s32.totalorder %s559_s13, 0 }
   0xc   : > { %s575_s18 = scalar_select %p26_p1, %s508_s11, %s28_s16  }
   0xd   : > { %p577_p5 = por %p36_p2, %p35_p0  ;;  %p581_p6 = por %p42_p4, %p41_p3 }
   0xe   : > { %p91_p7 = scmp.eq.s32.totalorder %s559_s13, 1  ;;  %p97_p8 = scmp.eq.s32.totalorder %s316_s14, 1 }
   0xf   : > { %s750_s20 = scalar_select %p581_p6, 1, 0 }
  0x10   : > { %p348_p10 = scmp.lt.s32.totalorder %s512_s12, 2  ;;  %p588_p11 = por %p91_p7, %p35_p0 }
  0x11   : > { %p592_p12 = por %p97_p8, %p41_p3  ;;  %s597_s23 = sand.u32 1, %s508_s11  }
  0x12   : > { %s751_s21 = scalar_select %p588_p11, 1, 0 }
  0x13   : > { %s752_s22 = scalar_select %p592_p12, 1, 0 }
  0x14   : > { %s320_s24 = sshll.u32 %s512_s12, 7  ;;  %s319_s25 = sshll.u32 %s597_s23, 4 }
  0x15   : > { %s606_s28 = scalar_lea.hbm %s744_s0, %s320_s24  ;;  %s121_s29 = scalar_lea.vmem [#allocation2], %s319_s25 }
  0x16   : > { %s127_s30 = sshll.u32 %s121_s29, 4  ;;  %p610_p13 = pnand %p348_p10, %p577_p5  ;;  %s614_s30 = int_to_ptr.vmem [resolvable:$true] %s127_s30 }
  0x17   : > { %s118_s4 = scalar_lea.sflag [#allocation3], %s597_s23  ;;  %s388_s5 = scalar_lea.hbm %s606_s28, 256 }
  0x18   : > { %p389_p1 = scmp.ne.s32.totalorder %s606_s28, %s388_s5  ;;  %p390_p2 = pneg %p610_p13 }
  0x19   : > { %s393_s8 = scalar_lea.hbm %s744_s0, 512  ;;  %p394_p5 = scmp.lt.s32.totalorder %s606_s28, %s744_s0 }
  0x1a   : > { %p391_p3 = pnand %p390_p2, %p389_p1  ;;  %p395_p7 = scmp.lt.s32.totalorder %s393_s8, %s388_s5 }
  0x1c   : > { %p392_p4 = pneg %p391_p3  ;;  %p396_p8 = por %p395_p7, %p394_p5 }
  0x1e   : > { %p397_p10 = pnand %p396_p8, %p392_p4 }
  0x20   : > { %400 = shalt.err (!%p397_p10)
}
  0x21   : > { %s401_s17 = scalar_lea.vmem %s614_s30, 256  ;;  %s514_s19 = smov [#allocation2]  }
  0x22   : > { %p402_p9 = scmp.ne.s32.totalorder %s614_s30, %s401_s17  ;;  %s406_s25 = sshll.u32 %s514_s19, 4  ;;  %s407_s25 = int_to_ptr.vmem [resolvable:$false] %s406_s25 }
  0x23   : > { %s408_s26 = scalar_lea.vmem %s407_s25, 512  ;;  %p409_p0 = scmp.lt.s32.totalorder %s614_s30, %s407_s25 }
  0x24   : > { %p404_p1 = pnand %p402_p9, %p390_p2  ;;  %p410_p12 = scmp.lt.s32.totalorder %s408_s26, %s401_s17 }
  0x26   : > { %p405_p3 = pneg %p404_p1  ;;  %p411_p11 = por %p410_p12, %p409_p0 }
  0x28   : > { %p412_p5 = pnand %p411_p11, %p405_p3 }
  0x2a   : > { %415 = shalt.err (!%p412_p5)
}
  0x2b   : > { %s515_s27 = smov 256   ;;  %s516_s29 = smov 128  }
  0x2c   : > { %s517_s5 = smov 8   ;;  %p153_p9 = scmp.lt.s32.totalorder %s512_s12, 3 }
  0x2d   : > { %340 = dma.hbm_to_vmem [thread:$0]  (!%p610_p13), %s606_s28, 256, %s614_s30, %s118_s4, %s515_s27, %s516_s29, %s517_s5  }
  0x2e   : > { %s321_s6 = sshll.u32 %s597_s23, 3  ;;  %s651_s14 = scalar_lea.hbm %s745_s1, %s320_s24 }
  0x2f   : > { %p754_p11 = scmp.ge.s32.totalorder %s512_s12, 1  ;;  %s141_s17 = scalar_lea.vmem [#allocation5], %s321_s6 }
  0x30   : > { %s148_s19 = sshll.u32 %s141_s17, 4  ;;  %s138_s28 = scalar_lea.sflag [#allocation6], %s597_s23  ;;  %s149_s19 = int_to_ptr.vmem [resolvable:$true] %s148_s19 }
  0x31   : > { %p655_p12 = pnand %p754_p11, %p153_p9  ;;  %s416_s30 = scalar_lea.hbm %s651_s14, 128 }
  0x32   : > { %p417_p0 = scmp.ne.s32.totalorder %s651_s14, %s416_s30  ;;  %s421_s25 = scalar_lea.hbm %s745_s1, 1024 }
  0x33   : > { %s755_s16 = scalar_select %p655_p12, 1, 0 }
  0x34   : > { %p419_p4 = pnand %p417_p0, %p390_p2  ;;  %p422_p8 = scmp.lt.s32.totalorder %s651_s14, %s745_s1 }
  0x35   : > { %p423_p10 = scmp.lt.s32.totalorder %s421_s25, %s416_s30 }
  0x36   : > { %p420_p7 = pneg %p419_p4 }
  0x37   : > { %p424_p1 = por %p423_p10, %p422_p8 }
  0x39   : > { %p425_p3 = pnand %p424_p1, %p420_p7 }
  0x3b   : > { %428 = shalt.err (!%p425_p3)
}
  0x3c   : > { %s429_s29 = scalar_lea.vmem %s149_s19, 128  ;;  %s518_s23 = smov [#allocation5]  }
  0x3d   : > { %p430_p5 = scmp.ne.s32.totalorder %s149_s19, %s429_s29  ;;  %s434_s5 = sshll.u32 %s518_s23, 4  ;;  %s435_s5 = int_to_ptr.vmem [resolvable:$false] %s434_s5 }
  0x3e   : > { %s436_s6 = scalar_lea.vmem %s435_s5, 256  ;;  %p437_p0 = scmp.lt.s32.totalorder %s149_s19, %s435_s5 }
  0x3f   : > { %p432_p9 = pnand %p430_p5, %p390_p2  ;;  %p438_p4 = scmp.lt.s32.totalorder %s436_s6, %s429_s29 }
  0x41   : > { %p433_p11 = pneg %p432_p9  ;;  %p439_p6 = por %p438_p4, %p437_p0 }
  0x43   : > { %p440_p12 = pnand %p439_p6, %p433_p11 }
  0x45   : > { %443 = shalt.err (!%p440_p12)
}
  0x46   : > { %343 = dma.hbm_to_vmem [thread:$0]  (!%p610_p13), %s651_s14, 128, %s149_s19, %s138_s28  }
  0x47   : > { %p756_p7 = scmp.ne.s32.totalorder %s755_s16, 0 }
  0x48   : > { %s681_s7 = sand.u32 (!%p756_p7), 1, %s504_s10   ;;  %p757_p2 = scmp.ne.s32.totalorder (!%p756_p7), %s750_s20, 0 }
  0x49   : > { %157 = sbr.rel (%p756_p7) target bundleno = 109 (0x6d), region = 28  ;;  %s324_s8 = sshll.u32 (!%p756_p7), %s681_s7, 4 }
  0x4a   : > { %s160_s17 = scalar_lea.sflag (!%p756_p7), [#allocation3], %s681_s7  ;;  %s163_s30 = scalar_lea.vmem (!%p756_p7), [#allocation2], %s324_s8 }
  0x4e   : > { %487 = dma.done.wait (%p757_p2), %s160_s17, 256  }
  0x4f   : > { %489 = vsyncadd (%p757_p2), %s160_s17, 4294967040  ;;  %s325_s3 = sshll.u32 %s681_s7, 3  ;;  %s169_s14 = scalar_lea.sflag [#allocation6], %s681_s7 }
  0x50   : > { %s172_s16 = scalar_lea.vmem [#allocation5], %s325_s3 }
  0x51   : > { %491 = dma.done.wait (%p757_p2), %s169_s14, 128  }
  0x52   : > { %493 = vsyncadd (%p757_p2), %s169_s14, 4294967168  ;;  %s197_s19 = scalar_lea.vmem [#allocation7], %s324_s8  ;;  %s328_s24 = sshll.u32 %s559_s13, 7  ;;  %v198_v0 = vld [vmem:[%s163_s30] sm:$0xff]  ;;  %v199_v2 = vld [vmem:[%s163_s30 + $0x8] sm:$0xff] }
  0x53   : > { %s220_s28 = sshll.u32 %s197_s19, 4  ;;  %v200_v1 = vld [vmem:[%s172_s16] sm:$0xff]  ;;  %v201_v3 = vmul.f32 11.313708, %v198_v0  ;;  %v202_v4 = vmul.f32 11.313708, %v199_v2  ;;  %s701_s20 = scalar_lea.hbm %s746_s2, %s328_s24  ;;  %s696_s28 = int_to_ptr.vmem [resolvable:$true] %s220_s28 }
  0x54   : > { %s208_s13 = scalar_lea.sflag [#allocation4], %s681_s7  ;;  %s444_s26 = scalar_lea.vmem %s696_s28, 256 }
  0x55   : > { %v203_v5 = vadd.f32 %v201_v3, %v200_v1  ;;  %v204_v6 = vadd.f32 %v202_v4, %v200_v1  ;;  %p445_p6 = scmp.ne.s32.totalorder %s696_s28, %s444_s26  ;;  %p758_p13 = scmp.ne.s32.totalorder %s751_s21, 0 }
  0x56   : > { %s519_s27 = smov [#allocation7]  }
  0x57   : > { %205 = vst [vmem:[%s197_s19] sm:$0xff] %v203_v5  ;;  %206 = vst [vmem:[%s197_s19 + $0x8] sm:$0xff] %v204_v6  ;;  %p446_p12 = pnand %p445_p6, %p758_p13  ;;  %s448_s29 = sshll.u32 %s519_s27, 4  ;;  %s449_s29 = int_to_ptr.vmem [resolvable:$false] %s448_s29 }
  0x58   : > { %s450_s23 = scalar_lea.vmem %s449_s29, 512  ;;  %p451_p10 = scmp.lt.s32.totalorder %s696_s28, %s449_s29 }
  0x59   : > { %p447_p8 = pneg %p446_p12  ;;  %p452_p1 = scmp.lt.s32.totalorder %s450_s23, %s444_s26 }
  0x5b   : > { %p453_p3 = por %p452_p1, %p451_p10 }
  0x5d   : > { %p454_p5 = pnand %p453_p3, %p447_p8 }
  0x5f   : > { %457 = shalt.err (!%p454_p5)
}
  0x60   : > { %s458_s5 = scalar_lea.hbm %s701_s20, 256  ;;  %s462_s17 = scalar_lea.hbm %s746_s2, 512 }
  0x61   : > { %p459_p9 = scmp.ne.s32.totalorder %s701_s20, %s458_s5  ;;  %p463_p4 = scmp.lt.s32.totalorder %s701_s20, %s746_s2 }
  0x62   : > { %p464_p7 = scmp.lt.s32.totalorder %s462_s17, %s458_s5 }
  0x63   : > { %p460_p11 = pnand %p459_p9, %p758_p13 }
  0x64   : > { %p465_p2 = por %p464_p7, %p463_p4 }
  0x65   : > { %p461_p0 = pneg %p460_p11 }
  0x67   : > { %p466_p6 = pnand %p465_p2, %p461_p0 }
  0x69   : > { %469 = shalt.err (!%p466_p6)
}
  0x6a   : > { %s520_s14 = smov 128   ;;  %s521_s16 = smov 256  }
  0x6b   : > { %s522_s19 = smov 8  }
  0x6c   : > { %335 = dma.vmem_to_hbm [thread:$0]  (%p758_p13), %s696_s28, 256, %s701_s20, %s208_s13, %s520_s14, %s521_s16, %s522_s19  }
  0x6d PF: > { %s235_s24 = sand.u32 1, %s500_s9   ;;  %p759_p12 = scmp.ne.s32.totalorder %s752_s22, 0 }
  0x6e   : > { %p760_p8 = scmp.ge.s32.totalorder %s512_s12, 2  ;;  %s236_s4 = scalar_lea.sflag [#allocation4], %s235_s24 }
  0x70   : > { %p345_p10 = pnand %p760_p8, %p759_p12 }
  0x72   : > { %p346_p1 = pneg %p345_p10 }
  0x74   : > { %495 = dma.done.wait (%p346_p1), %s236_s4, 256  }
  0x75   : > { %497 = vsyncadd (%p346_p1), %s236_s4, 4294967040  ;;  %p18_p3 = scmp.ge.s32.totalorder %s563_s15, 4   ;;  %s761_s9 = smov %s504_s10 }
  0x76   : > { %s762_s10 = smov %s508_s11  ;;  %s763_s11 = smov %s575_s18 }
  0x77   : > { %s764_s12 = smov %s563_s15  ;;  %20 = sbr.rel (!%p18_p3) target bundleno = 7 (0x7), region = 86 }
  0x7c   :  { %241 = vsyncpa [#allocation3], 1 }
  0x7d   :  { %243 = vsyncpa [#allocation3 + $0x1], 1 }
  0x7e   :  { %244 = vsyncpa [#allocation6], 1 }
  0x7f   :  { %246 = vsyncpa [#allocation6 + $0x1], 1 }
  0x80   :  { %247 = vsyncpa [#allocation4], 1 }
  0x81   :  { %249 = vsyncpa [#allocation4 + $0x1], 1 }

</bundles_post_ra>
